<compile_context>
chip_gen: v7x
topology: tpu7x:2x2x1
jax: 0.10.0
libtpu: 0.0.40
codegen_flags: <defaults>
</compile_context>

<pallas_src>
import functools

import numpy as np
import jax
import jax.numpy as jnp
from jax import lax
from jax.experimental import pallas as pl
from jax.experimental.pallas import tpu as pltpu


# ---------------------------------------------------------------------------
# pltpu.roll direction probe (tiny one-off kernel, makes the shift sign robust
# to the rotate convention of the underlying tpu.rotate op).
# ---------------------------------------------------------------------------
def _roll_probe_kernel(x_ref, o_ref):
    o_ref[...] = pltpu.roll(x_ref[...], shift=1, axis=1)


def _detect_roll_sign():
    """Returns s such that pltpu.roll(x, shift=(s*off) % n, axis=-1)[..., p]
    equals x[..., p + off] (for in-range p + off)."""
    x = jnp.broadcast_to(jnp.arange(128, dtype=jnp.float32), (8, 128))
    y = pl.pallas_call(
        _roll_probe_kernel,
        out_shape=jax.ShapeDtypeStruct((8, 128), jnp.float32))(x)
    y = jax.block_until_ready(y)
    # jnp.roll convention: out[i] = in[i - shift]  ->  out[0] == 127.
    return -1 if float(y[0, 0]) > 64.0 else +1


# ---------------------------------------------------------------------------
# Fused bottleneck kernel
# ---------------------------------------------------------------------------
def resblock_kernel(x_ref, m_ref, w1_ref, b1_ref, w2_ref, b2_ref,
                    w3_ref, b3_ref, o_ref, *, n, h, w, roll_sign):
    nhw = n * h * w

    x = x_ref[...]                                        # (Cin, NHW) f32

    # ---- conv1 (1x1) + folded BN1 + ReLU -> (Cmid, NHW) ----
    h1 = jnp.dot(w1_ref[...], x.astype(w1_ref.dtype),
                 preferred_element_type=jnp.float32)
    h1 = jnp.maximum(h1 + b1_ref[...], 0.0)

    # ---- conv2 (3x3, stride 1, pad 1) + folded BN2 + ReLU -> (Cmid, NHW) ----
    # 9 shifted copies of h1 via lane rolls (XLU), stacked on sublanes; the
    # zero padding at image borders is a precomputed 0/1 mask.  One MXU dot.
    taps = []
    for ky in range(3):
        for kx in range(3):
            off = (ky - 1) * w + (kx - 1)
            if off == 0:
                taps.append(h1)
            else:
                taps.append(pltpu.roll(h1, shift=(roll_sign * off) % nhw,
                                       axis=1))
    cols = jnp.concatenate(taps, axis=0) * m_ref[...]     # (9*Cmid, NHW) f32
    h2 = jnp.dot(w2_ref[...], cols.astype(w2_ref.dtype),
                 preferred_element_type=jnp.float32)
    h2 = jnp.maximum(h2 + b2_ref[...], 0.0)

    # ---- conv3 (1x1) + folded BN3 + residual add + ReLU -> (Cout, NHW) ----
    h3 = jnp.dot(w3_ref[...], h2.astype(w3_ref.dtype),
                 preferred_element_type=jnp.float32)
    h3 = jnp.maximum(h3 + b3_ref[...] + x, 0.0)           # Cin == Cout

    o_ref[...] = h3.astype(o_ref.dtype)


def resblock_pallas(x_cnhw, masks, w1, b1, w2, b2, w3, b3, *, n, h, w,
                    roll_sign):
    cin, nhw = x_cnhw.shape
    cout = w3.shape[0]
    kernel = functools.partial(resblock_kernel, n=n, h=h, w=w,
                               roll_sign=roll_sign)

    def full(shape):
        return pl.BlockSpec(shape, lambda i, _nd=len(shape): (0,) * _nd)

    return pl.pallas_call(
        kernel,
        out_shape=jax.ShapeDtypeStruct((cout, nhw), jnp.float32),
        grid_spec=pltpu.PrefetchScalarGridSpec(
            num_scalar_prefetch=0,
            grid=(1,),                       # whole (tiny) batch in one step
            in_specs=[full(x_cnhw.shape), full(masks.shape),
                      full(w1.shape), full(b1.shape),
                      full(w2.shape), full(b2.shape),
                      full(w3.shape), full(b3.shape)],
            out_specs=full((cout, nhw)),
        ),
        compiler_params=pltpu.CompilerParams(
            dimension_semantics=("arbitrary",),
            # explicit VMEM budget (v7x: 64 MiB physical / 32 MiB scoped)
            vmem_limit_bytes=32 * 1024 * 1024),
    )(x_cnhw, masks, w1, b1, w2, b2, w3, b3)


# ---------------------------------------------------------------------------
# Wrapper-side preprocessing
# ---------------------------------------------------------------------------
def fold_bn_into_conv(w_oihw, conv_b, gamma, beta, mean, var, eps=1e-5):
    scale = gamma / jnp.sqrt(var + eps)                  # (Cout,)
    w = w_oihw * scale[:, None, None, None]              # scale -> weights
    b = beta + (conv_b - mean) * scale                   # per-channel bias
    return w, b


def pack_params(p, mxu_dtype=jnp.float32):
    w1f, b1 = fold_bn_into_conv(p['w1'], p['cb1'], p['g1'], p['be1'],
                                p['m1'], p['v1'])
    w2f, b2 = fold_bn_into_conv(p['w2'], p['cb2'], p['g2'], p['be2'],
                                p['m2'], p['v2'])
    w3f, b3 = fold_bn_into_conv(p['w3'], p['cb3'], p['g3'], p['be3'],
                                p['m3'], p['v3'])
    cmid = w1f.shape[0]
    W1 = w1f[:, :, 0, 0].astype(mxu_dtype)                       # (Cmid, Cin)
    # rows ordered (ky, kx, ci) to match the tap stacking inside the kernel
    W2 = jnp.transpose(w2f, (0, 2, 3, 1)).reshape(cmid, 9 * cmid)
    W2 = W2.astype(mxu_dtype)                                    # (Cmid, 9*Cmid)
    W3 = w3f[:, :, 0, 0].astype(mxu_dtype)                       # (Cout, Cmid)
    return (W1, b1.reshape(-1, 1).astype(jnp.float32),
            W2, b2.reshape(-1, 1).astype(jnp.float32),
            W3, b3.reshape(-1, 1).astype(jnp.float32))


def build_conv3x3_masks(n, h, w, cmid):
    """(9*cmid, n*h*w) 0/1 mask implementing the zero padding of each tap."""
    pix = np.arange(n * h * w)
    xc = pix % w
    yc = (pix // w) % h
    rows = []
    for ky in range(3):
        for kx in range(3):
            dy, dx = ky - 1, kx - 1
            v = ((xc + dx >= 0) & (xc + dx < w) &
                 (yc + dy >= 0) & (yc + dy < h)).astype(np.float32)
            rows.append(np.repeat(v[None, :], cmid, axis=0))
    return jnp.asarray(np.concatenate(rows, axis=0))


# ---------------- parameter construction (deterministic, synthetic) ---------
def make_params(key, in_ch, out_ch):
    exp = 4
    ks = jax.random.split(key, 20)

    def conv_w(k, co, ci, kh, kw):
        bound = 1.0 / jnp.sqrt(ci * kh * kw)
        return jax.random.uniform(k, (co, ci, kh, kw), jnp.float32, -bound, bound)

    def vec(k, c, lo, hi):
        return jax.random.uniform(k, (c,), jnp.float32, lo, hi)

    p = {}
    p['w1'] = conv_w(ks[0], out_ch, in_ch, 1, 1)
    p['cb1'] = vec(ks[1], out_ch, -0.1, 0.1)
    p['g1'], p['be1'] = vec(ks[2], out_ch, 0.5, 1.5), vec(ks[3], out_ch, -0.1, 0.1)
    p['m1'], p['v1'] = vec(ks[4], out_ch, -0.1, 0.1), vec(ks[5], out_ch, 0.5, 1.5)
    p['w2'] = conv_w(ks[6], out_ch, out_ch, 3, 3)
    p['cb2'] = vec(ks[7], out_ch, -0.1, 0.1)
    p['g2'], p['be2'] = vec(ks[8], out_ch, 0.5, 1.5), vec(ks[9], out_ch, -0.1, 0.1)
    p['m2'], p['v2'] = vec(ks[10], out_ch, -0.1, 0.1), vec(ks[11], out_ch, 0.5, 1.5)
    co = out_ch * exp
    p['w3'] = conv_w(ks[12], co, out_ch, 1, 1)
    p['cb3'] = vec(ks[13], co, -0.1, 0.1)
    p['g3'], p['be3'] = vec(ks[14], co, 0.5, 1.5), vec(ks[15], co, -0.1, 0.1)
    p['m3'], p['v3'] = vec(ks[16], co, -0.1, 0.1), vec(ks[17], co, 0.5, 1.5)
    return p


# ---------------- pure-JAX reference (for verification) ---------------------
def ref_forward_nchw(x, p, eps=1e-5):
    def conv(x, w, b, pad):
        y = lax.conv_general_dilated(
            x, w, window_strides=(1, 1), padding=[(pad, pad), (pad, pad)],
            dimension_numbers=('NCHW', 'OIHW', 'NCHW'))
        return y + b[None, :, None, None]

    def bn(x, g, b, m, v):
        return ((x - m[None, :, None, None])
                / jnp.sqrt(v[None, :, None, None] + eps)
                * g[None, :, None, None] + b[None, :, None, None])

    identity = x
    h = jax.nn.relu(bn(conv(x, p['w1'], p['cb1'], 0),
                       p['g1'], p['be1'], p['m1'], p['v1']))
    h = jax.nn.relu(bn(conv(h, p['w2'], p['cb2'], 1),
                       p['g2'], p['be2'], p['m2'], p['v2']))
    h = bn(conv(h, p['w3'], p['cb3'], 0), p['g3'], p['be3'], p['m3'], p['v3'])
    return jax.nn.relu(h + identity)


if __name__ == "__main__":
    # in_channels == out_channels * expansion so the identity residual works
    # (identity_downsample=None, as in the PyTorch defaults).
    N, in_ch, out_ch, H, W = 2, 16, 4, 16, 16
    key = jax.random.PRNGKey(0)
    kx_, kp_ = jax.random.split(key)

    x_nchw = jax.random.normal(kx_, (N, in_ch, H, W), jnp.float32)
    p = make_params(kp_, in_ch, out_ch)

    roll_sign = _detect_roll_sign()
    # channels -> sublanes, pixels -> lanes (lane-dense: N*H*W = 512 lanes)
    x_t = jnp.transpose(x_nchw, (1, 0, 2, 3)).reshape(in_ch, N * H * W)
    masks = build_conv3x3_masks(N, H, W, out_ch)
    ref = ref_forward_nchw(x_nchw, p)

    # f32 (tight check) and bf16-MXU-operand (v6e/v7x recommendation) paths.
    for name, dt, tol in (("f32", jnp.float32, 2e-3),
                          ("bf16", jnp.bfloat16, 1e-1)):
        W1, b1, W2, b2, W3, b3 = pack_params(p, mxu_dtype=dt)
        out_t = resblock_pallas(x_t, masks, W1, b1, W2, b2, W3, b3,
                                n=N, h=H, w=W, roll_sign=roll_sign)
        out_t = jax.block_until_ready(out_t)
        out_nchw = jnp.transpose(out_t.reshape(out_ch * 4, N, H, W),
                                 (1, 0, 2, 3))                 # back to NCHW
        assert out_nchw.shape == (N, out_ch * 4, H, W)
        max_err = float(jnp.max(jnp.abs(out_nchw - ref)))
        assert jnp.allclose(out_nchw, ref, atol=tol, rtol=tol), (name, max_err)

    print("KERNEL_OK")
</pallas_src>

<mosaic_0001>
module attributes {stable_mosaic.version = 11 : i64} {
  func.func @_roll_probe_kernel(%arg0: memref<8x128xf32, #tpu.memory_space<vmem>>, %arg1: memref<8x128xf32, #tpu.memory_space<vmem>>) attributes {dimension_semantics = [], scalar_prefetch = 0 : i64, scratch_operands = 0 : i64, tpu.core_type = #tpu.core_type<tc>} {
    %c0 = arith.constant 0 : index
    %c0_0 = arith.constant 0 : index
    %0 = vector.load %arg0[%c0, %c0_0] : memref<8x128xf32, #tpu.memory_space<vmem>>, vector<8x128xf32>
    %c1_i32 = arith.constant 1 : i32
    %1 = tpu.dynamic_rotate %0 by %c1_i32 dim 1 : vector<8x128xf32>, i32 -> vector<8x128xf32>
    %c0_1 = arith.constant 0 : index
    %c0_2 = arith.constant 0 : index
    %2 = vector.load %arg1[%c0_1, %c0_2] : memref<8x128xf32, #tpu.memory_space<vmem>>, vector<8x128xf32>
    tpu.vector_store %arg1[%c0_1, %c0_2], %1 {strides = array<i32>} : memref<8x128xf32, #tpu.memory_space<vmem>>, vector<8x128xf32>,
    return
  }
}

</mosaic_0001>

<bundles_post_ra>
// kernel: tpu_custom_call.1
= control target key start
LH: loop header
LB: loop body
LE: loop exit
PB: predicated region body
PF: predicated region fallthrough
CT: control target
= control target key end

     0   :  { %6 = vsyncpa [#allocation3], 0  ;;  %s128_s0 = inlined_call_operand.hbm [shape: f32[8,128], index: 0, kind: input, shape index: {}]   ;;  %s129_s1 = inlined_call_operand.hbm [shape: f32[8,128], index: 1, kind: output, shape index: {}]  }
   0x1   :  { %7 = vsyncpa [#allocation4], 0  ;;  %s91_s6 = smov [#allocation2]   ;;  %s43_s10 = scalar_lea.hbm %s128_s0, 128 }
   0x2   :  { %s14_s7 = sshll.u32 %s91_s6, 4  ;;  %p44_p0 = scmp.ne.s32.totalorder %s128_s0, %s43_s10  ;;  %s15_s7 = int_to_ptr.vmem [resolvable:$true] %s14_s7 }
   0x3   :  { %p47_p1 = scmp.lt.u32.totalorder %s43_s10, %s128_s0 }
   0x5   :  { %p49_p2 = pnand %p47_p1, %p44_p0 }
   0x7   :  { %52 = shalt.err (!%p49_p2)
}
   0x8   :  { %s53_s15 = scalar_lea.vmem %s15_s7, 128  ;;  %p58_p4 = scmp.lt.s32.totalorder %s15_s7, %s15_s7 }
   0x9   :  { %p54_p3 = scmp.ne.s32.totalorder %s15_s7, %s53_s15  ;;  %p59_p5 = scmp.lt.s32.totalorder %s53_s15, %s53_s15 }
   0xb   :  { %p60_p6 = por %p59_p5, %p58_p4 }
   0xd   :  { %p61_p7 = pnand %p60_p6, %p54_p3 }
   0xf   :  { %64 = shalt.err (!%p61_p7)
}
  0x10   :  { %17 = dma.hbm_to_vmem [thread:$0]  %s128_s0, 128, %s15_s7, [#allocation3]  }
  0x11   :  { %87 = dma.done.wait [#allocation3], 128  }
  0x12   :  { %88 = vsyncadd [#allocation3], 4294967168  ;;  %v21_v0 = vld [vmem:[#allocation2] sm:$0xff]  ;;  %s92_s18 = smov 1   ;;  %s93_s19 = smov [#allocation5]  }
  0x13   :  { %22 = vrot.lane.b32.xlu0 %v21_v0, %s92_s18  ;;  %s31_s20 = sshll.u32 %s93_s19, 4  ;;  %s32_s20 = int_to_ptr.vmem [resolvable:$true] %s31_s20 }
  0x14   :  { %s65_s21 = scalar_lea.vmem %s32_s20, 128  ;;  %p70_p9 = scmp.lt.s32.totalorder %s32_s20, %s32_s20 }
  0x15   :  { %p66_p8 = scmp.ne.s32.totalorder %s32_s20, %s65_s21  ;;  %p71_p10 = scmp.lt.s32.totalorder %s65_s21, %s65_s21 }
  0x17   :  { %p72_p11 = por %p71_p10, %p70_p9 }
  0x19   :  { %p73_p12 = pnand %p72_p11, %p66_p8 }
  0x85   :  { %v23_v1 = vpop.permute.xlu0 %22 }
  0x86   :  { %24 = vst [vmem:[#allocation5] sm:$0xff] %v23_v1 }
  0x87   :  { %76 = shalt.err (!%p73_p12)
}
  0x88   :  { %s77_s0 = scalar_lea.hbm %s129_s1, 128 }
  0x89   :  { %p78_p13 = scmp.ne.s32.totalorder %s129_s1, %s77_s0  ;;  %p81_p0 = scmp.lt.u32.totalorder %s77_s0, %s129_s1 }
  0x8b   :  { %p83_p1 = pnand %p81_p0, %p78_p13 }
  0x8d   :  { %86 = shalt.err (!%p83_p1)
}
  0x8e   :  { %34 = dma.vmem_to_hbm [thread:$0]  %s32_s20, 128, %s129_s1, [#allocation4]  }
  0x8f   :  { %89 = dma.done.wait [#allocation4], 128  }
  0x90   :  { %90 = vsyncadd [#allocation4], 4294967168 }
  0x91   :  { %38 = vsyncpa [#allocation3], 1 }
  0x92   :  { %39 = vsyncpa [#allocation4], 1 }

</bundles_post_ra>
